<compile_context>
chip_gen: v7x
topology: tpu7x:2x2x1
jax: 0.10.0
libtpu: 0.0.40
codegen_flags: <defaults>
</compile_context>

<pallas_src>
import functools

import jax
import jax.numpy as jnp
from jax import lax
from jax.experimental import pallas as pl
from jax.experimental.pallas import tpu as pltpu

LANES = 128
SUBLANES = 8
CHUNK_ROWS = 64              # (64,128) f32 chunk = 8 vregs per intermediate
_NEUTRAL_LOGIT = 100.0       # with target=1 -> bce ~ 0, (1-pt)^gamma = 0 -> focal = 0
_NEUTRAL_TARGET = 1.0


def _round_up(x, m):
    return ((x + m - 1) // m) * m


def _default_block_bytes():
    """Per-input pipeline-block size in bytes, chosen per TPU generation."""
    try:
        kind = jax.devices()[0].device_kind.lower()
    except Exception:
        kind = ""
    if "v5 lite" in kind or "v5lite" in kind or "v5e" in kind:
        return 1 * 1024 * 1024   # stay well inside v5e's 16 MiB scoped-VMEM default
    if "7" in kind:              # v7x: ~3.2 TB/s per TC -> amortize per-step overhead
        return 4 * 1024 * 1024
    return 2 * 1024 * 1024       # v6e & friends: 1-2 MiB/block sits at the HBM knee


def _focal_kernel(gamma, binary_fast_path, rows, block_rows, chunk_rows,
                  x_ref, t_ref, out_ref):
    """One grid step: focal-loss partial sum of a (block_rows, 128) slab.

    out_ref is a per-step (8,128) f32 partial (one output block per grid step, so
    the grid axis is 'parallel' / megacore-shardable with no cross-step state).
    """
    num_chunks = block_rows // chunk_rows
    j = pl.program_id(0)

    def chunk_focal(x, t):
        x = x.astype(jnp.float32)
        t = t.astype(jnp.float32)
        e = jnp.exp(-jnp.abs(x))
        # Numerically stable BCE with logits (== F.binary_cross_entropy_with_logits):
        #   bce = max(x, 0) - x*t + log1p(exp(-|x|))
        bce = jnp.maximum(x, 0.0) - x * t + jnp.log1p(e)
        if binary_fast_path:
            # Hard {0,1} targets only: 1 - pt == (e if sign(x) "matches" t else 1)/(1+e).
            # Saves the second full exp; uses the EUP approximate reciprocal.
            num = jnp.where((x >= 0.0) == (t > 0.5), e, 1.0)
            d = num * pl.reciprocal(1.0 + e, approx=True)
        else:
            d = 1.0 - jnp.exp(-bce)          # exact; also correct for soft targets
        if gamma == 2.0:
            mod = d * d                      # avoid pow -> log+exp on the EUP
        elif gamma == 1.0:
            mod = d
        elif gamma == 0.0:
            mod = jnp.ones_like(d)
        else:
            mod = jnp.power(d, gamma)        # d >= 0 by construction
        return mod * bce                     # alpha applied once in the wrapper

    def accumulate(masked):
        def body(i, acc):
            r0 = pl.multiple_of(i * chunk_rows, SUBLANES)
            x = x_ref[pl.ds(r0, chunk_rows), :]
            t = t_ref[pl.ds(r0, chunk_rows), :]
            if masked:
                # Partial / over-read last block: replace garbage rows with neutral
                # values BEFORE the exp/log chain (NaN * 0 == NaN otherwise).
                row = (j * block_rows + r0
                       + lax.broadcasted_iota(jnp.int32, (chunk_rows, LANES), 0))
                valid = row < rows
                x = jnp.where(valid, x.astype(jnp.float32), _NEUTRAL_LOGIT)
                t = jnp.where(valid, t.astype(jnp.float32), _NEUTRAL_TARGET)
            f = chunk_focal(x, t)
            # (chunk_rows,128) -> (chunk_rows//8, 8, 128) is a layout-preserving
            # regroup by vreg tile; the axis-0 sum is VALU-only adds (no XLU).
            return acc + jnp.sum(
                f.reshape(chunk_rows // SUBLANES, SUBLANES, LANES), axis=0)

        acc = lax.fori_loop(0, num_chunks, body,
                            jnp.zeros((SUBLANES, LANES), jnp.float32))
        out_ref[...] = acc

    if rows % block_rows != 0:
        last = pl.num_programs(0) - 1

        @pl.when(j == last)
        def _():
            accumulate(masked=True)

        @pl.when(j < last)
        def _():
            accumulate(masked=False)
    else:
        accumulate(masked=False)


def focal_loss(inputs, targets, gamma=2.0, alpha=0.25, reduction="mean",
               assume_binary_targets=False, block_bytes=None):
    """Pallas TPU focal loss. inputs/targets: same shape (e.g. NCHW logits / labels).

    Inputs and targets stay in their native dtype in HBM (bf16 / int8 / bool labels
    are fine); the kernel upcasts in VMEM. `assume_binary_targets=True` enables a
    slightly-approximate fast path that is only valid for hard {0,1} targets.
    """
    assert inputs.shape == targets.shape
    n = inputs.size

    x = inputs.reshape(-1)                   # free reshape; keep native dtype
    t = targets.reshape(-1)

    if n % LANES != 0:
        # TODO(synk): this rare fallback (n not a multiple of 128) still re-copies the
        # tensor via concatenate; the <=127 appended elements are neutral (focal == 0).
        pad = _round_up(n, LANES) - n
        x = jnp.concatenate([x, jnp.full((pad,), _NEUTRAL_LOGIT, dtype=x.dtype)])
        t = jnp.concatenate([t, jnp.full((pad,), _NEUTRAL_TARGET, dtype=t.dtype)])

    rows = x.size // LANES
    x = x.reshape(rows, LANES)               # zero-copy 2-D lane-aligned view
    t = t.reshape(rows, LANES)

    if block_bytes is None:
        block_bytes = _default_block_bytes()
    itemsize = max(x.dtype.itemsize, t.dtype.itemsize)

    rows8 = _round_up(rows, SUBLANES)
    chunk_rows = min(CHUNK_ROWS, rows8)                       # multiple of 8
    target_rows = max(chunk_rows,
                      (block_bytes // (itemsize * LANES)) // chunk_rows * chunk_rows)
    block_rows = min(target_rows, _round_up(rows8, chunk_rows))  # multiple of chunk_rows
    num_blocks = pl.cdiv(rows, block_rows)

    kernel = functools.partial(_focal_kernel, float(gamma), bool(assume_binary_targets),
                               rows, block_rows, chunk_rows)

    partials = pl.pallas_call(
        kernel,
        out_shape=jax.ShapeDtypeStruct((num_blocks, SUBLANES, LANES), jnp.float32),
        grid=(num_blocks,),
        in_specs=[
            pl.BlockSpec((block_rows, LANES), lambda j: (j, 0)),
            pl.BlockSpec((block_rows, LANES), lambda j: (j, 0)),
        ],
        out_specs=pl.BlockSpec((None, SUBLANES, LANES), lambda j: (j, 0, 0)),
        compiler_params=pltpu.CompilerParams(
            dimension_semantics=("parallel",),
            vmem_limit_bytes=32 * 1024 * 1024,
        ),
    )(x, t)

    total = jnp.float32(alpha) * jnp.sum(partials)   # tiny collapse + hoisted alpha
    if reduction == "mean":
        return total / jnp.float32(n)
    elif reduction == "sum":
        return total
    else:
        # TODO(synk): reduction='none' (full elementwise output) would need a separate
        # elementwise-output kernel; the module defaults to 'mean'.
        raise NotImplementedError("reduction='none' not implemented in this kernel")


def _reference_focal_loss(inputs, targets, gamma=2.0, alpha=0.25, reduction="mean"):
    x = inputs.astype(jnp.float32)
    t = targets.astype(jnp.float32)
    bce = jnp.maximum(x, 0.0) - x * t + jnp.log1p(jnp.exp(-jnp.abs(x)))
    pt = jnp.exp(-bce)
    fl = alpha * (1.0 - pt) ** gamma * bce
    return fl.mean() if reduction == "mean" else fl.sum()


if __name__ == "__main__":
    key = jax.random.PRNGKey(0)
    keys = jax.random.split(key, 8)

    # 1) Canonical small NCHW logits / binary labels (aligned, single block).
    B, C, H, W = 2, 4, 16, 16
    x1 = jax.random.normal(keys[0], (B, C, H, W), dtype=jnp.float32)
    t1 = jax.random.bernoulli(keys[1], p=0.3, shape=(B, C, H, W)).astype(jnp.float32)
    out = jax.block_until_ready(focal_loss(x1, t1, gamma=2.0, alpha=0.25))
    ref = _reference_focal_loss(x1, t1)
    assert jnp.allclose(out, ref, rtol=1e-4, atol=1e-6), ("mean", out, ref)

    out_s = jax.block_until_ready(focal_loss(x1, t1, reduction="sum"))
    ref_s = _reference_focal_loss(x1, t1, reduction="sum")
    assert jnp.allclose(out_s, ref_s, rtol=1e-4, atol=1e-5), ("sum", out_s, ref_s)

    # 2) Shape not divisible by 128 -> neutral tail-pad fallback path.
    shp2 = (3, 5, 7, 11)
    x2 = jax.random.normal(keys[2], shp2, dtype=jnp.float32)
    t2 = jax.random.bernoulli(keys[3], p=0.5, shape=shp2).astype(jnp.float32)
    out2 = jax.block_until_ready(focal_loss(x2, t2))
    ref2 = _reference_focal_loss(x2, t2)
    assert jnp.allclose(out2, ref2, rtol=1e-4, atol=1e-6), ("pad", out2, ref2)

    # 3) Multi-block grid + in-kernel-masked partial last block + soft targets
    #    (small block_bytes so the grid has >1 step at this tiny size).
    shp3 = (3, 4, 25, 128)         # 38400 elems = 300 rows of 128
    x3 = jax.random.normal(keys[4], shp3, dtype=jnp.float32)
    t3 = jax.random.uniform(keys[5], shp3, dtype=jnp.float32)
    out3 = jax.block_until_ready(focal_loss(x3, t3, block_bytes=64 * 1024))
    ref3 = _reference_focal_loss(x3, t3)
    assert jnp.allclose(out3, ref3, rtol=1e-4, atol=1e-6), ("masked", out3, ref3)

    # 4) bf16 logits / bf16 labels stay narrow in HBM; kernel upcasts in VMEM.
    shp4 = (2, 4, 64, 64)
    x4 = jax.random.normal(keys[6], shp4, dtype=jnp.bfloat16)
    t4 = jax.random.bernoulli(keys[7], p=0.4, shape=shp4).astype(jnp.bfloat16)
    out4 = jax.block_until_ready(focal_loss(x4, t4))
    ref4 = _reference_focal_loss(x4, t4)
    assert jnp.allclose(out4, ref4, rtol=1e-4, atol=1e-6), ("bf16", out4, ref4)

    # 5) Opt-in binary-target fast path (one fewer exp + approx reciprocal).
    out5 = jax.block_until_ready(focal_loss(x1, t1, assume_binary_targets=True))
    assert jnp.allclose(out5, ref, rtol=5e-3, atol=1e-5), ("binary_fast", out5, ref)

    print("KERNEL_OK")
</pallas_src>

<mosaic_0001>
module attributes {stable_mosaic.version = 11 : i64} {
  func.func @_focal_kernel(%arg0: i32, %arg1: memref<16x128xf32, #tpu.memory_space<vmem>>, %arg2: memref<16x128xf32, #tpu.memory_space<vmem>>, %arg3: memref<1x8x128xf32, #tpu.memory_space<vmem>>) attributes {dimension_semantics = [#tpu.dimension_semantics<parallel>], iteration_bounds = array<i64: 1>, scalar_prefetch = 0 : i64, scratch_operands = 0 : i64, tpu.core_type = #tpu.core_type<tc>, window_params = [{transform_indices = @transform_0, window_bounds = array<i64: 16, 128>}, {transform_indices = @transform_1, window_bounds = array<i64: 16, 128>}, {transform_indices = @transform_2, window_bounds = array<i64: 1, 8, 128>}]} {
    %cst = arith.constant 0.000000e+00 : f32
    %0 = vector.broadcast %cst : f32 to vector<8x128xf32>
    %c0_i32 = arith.constant 0 : i32
    %c16_i32 = arith.constant 16 : i32
    %1 = arith.muli %c0_i32, %c16_i32 : i32
    %2 = tpu.assume_multiple %1, 8 : i32
    %3 = arith.index_cast %2 : i32 to index
    %c0 = arith.constant 0 : index
    %4 = vector.load %arg1[%3, %c0] : memref<16x128xf32, #tpu.memory_space<vmem>>, vector<16x128xf32>
    %5 = arith.index_cast %2 : i32 to index
    %c0_0 = arith.constant 0 : index
    %6 = vector.load %arg2[%5, %c0_0] : memref<16x128xf32, #tpu.memory_space<vmem>>, vector<16x128xf32>
    %7 = math.absf %4 : vector<16x128xf32>
    %cst_1 = arith.constant 0.000000e+00 : f32
    %8 = vector.broadcast %cst_1 : f32 to vector<16x128xf32>
    %9 = arith.subf %8, %7 : vector<16x128xf32>
    %10 = math.exp %9 : vector<16x128xf32>
    %cst_2 = arith.constant 0.000000e+00 : f32
    %11 = vector.broadcast %cst_2 : f32 to vector<16x128xf32>
    %12 = arith.maximumf %4, %11 : vector<16x128xf32>
    %13 = arith.mulf %4, %6 : vector<16x128xf32>
    %14 = arith.subf %12, %13 : vector<16x128xf32>
    %15 = math.log1p %10 : vector<16x128xf32>
    %16 = arith.addf %14, %15 : vector<16x128xf32>
    %cst_3 = arith.constant 0.000000e+00 : f32
    %17 = vector.broadcast %cst_3 : f32 to vector<16x128xf32>
    %18 = arith.subf %17, %16 : vector<16x128xf32>
    %19 = math.exp %18 : vector<16x128xf32>
    %cst_4 = arith.constant 1.000000e+00 : f32
    %20 = vector.broadcast %cst_4 : f32 to vector<16x128xf32>
    %21 = arith.subf %20, %19 : vector<16x128xf32>
    %22 = arith.mulf %21, %21 : vector<16x128xf32>
    %23 = arith.mulf %22, %16 : vector<16x128xf32>
    %24 = vector.shape_cast %23 : vector<16x128xf32> to vector<2x8x128xf32>
    %cst_5 = arith.constant dense<0.000000e+00> : vector<8x128xf32>
    %25 = vector.multi_reduction <add>, %24, %cst_5 [0] : vector<2x8x128xf32> to vector<8x128xf32>
    %26 = arith.addf %0, %25 : vector<8x128xf32>
    %c1_i32 = arith.constant 1 : i32
    %c0_6 = arith.constant 0 : index
    %c0_7 = arith.constant 0 : index
    %c0_8 = arith.constant 0 : index
    %27 = vector.load %arg3[%c0_6, %c0_7, %c0_8] : memref<1x8x128xf32, #tpu.memory_space<vmem>>, vector<1x8x128xf32>
    %28 = vector.shape_cast %27 : vector<1x8x128xf32> to vector<8x128xf32>
    %29 = vector.shape_cast %26 : vector<8x128xf32> to vector<1x8x128xf32>
    tpu.vector_store %arg3[%c0_6, %c0_7, %c0_8], %29 {strides = array<i32>} : memref<1x8x128xf32, #tpu.memory_space<vmem>>, vector<1x8x128xf32>,
    return
  }
  func.func @transform_0(%arg0: i32) -> (i32, i32) {
    %c0_i32 = arith.constant 0 : i32
    %c0_i32_0 = arith.constant 0 : i32
    return %arg0, %c0_i32 : i32, i32
  }
  func.func @transform_1(%arg0: i32) -> (i32, i32) {
    %c0_i32 = arith.constant 0 : i32
    %c0_i32_0 = arith.constant 0 : i32
    return %arg0, %c0_i32 : i32, i32
  }
  func.func @transform_2(%arg0: i32) -> (i32, i32, i32) {
    %c0_i32 = arith.constant 0 : i32
    %c0_i32_0 = arith.constant 0 : i32
    %c0_i32_1 = arith.constant 0 : i32
    return %arg0, %c0_i32, %c0_i32_0 : i32, i32, i32
  }
}

</mosaic_0001>

<bundles_post_ra>
// kernel: tpu_custom_call.1
= control target key start
LH: loop header
LB: loop body
LE: loop exit
PB: predicated region body
PF: predicated region fallthrough
CT: control target
= control target key end

     0   :  { %7 = vsyncpa [#allocation3], 0  ;;  %s254_s0 = inlined_call_operand.hbm [shape: f32[16,128], index: 0, kind: input, shape index: {}]   ;;  %s255_s1 = inlined_call_operand.hbm [shape: f32[16,128], index: 1, kind: input, shape index: {}]   ;;  %s256_s2 = inlined_call_operand.hbm [shape: f32[1,8,128], index: 2, kind: output, shape index: {}]  }
   0x1   :  { %8 = vsyncpa [#allocation6], 0 }
   0x2   :  { %9 = vsyncpa [#allocation4], 0  ;;  %s198_s9 = smov [#allocation2]   ;;  %s126_s13 = scalar_lea.hbm %s254_s0, 256 }
   0x3   :  { %s15_s10 = sshll.u32 %s198_s9, 4  ;;  %p127_p0 = scmp.ne.s32.totalorder %s254_s0, %s126_s13  ;;  %s16_s10 = int_to_ptr.vmem [resolvable:$true] %s15_s10 }
   0x4   :  { %p130_p1 = scmp.lt.u32.totalorder %s126_s13, %s254_s0 }
   0x6   :  { %p132_p2 = pnand %p130_p1, %p127_p0 }
   0x8   :  { %135 = shalt.err (!%p132_p2)
}
   0x9   :  { %s136_s18 = scalar_lea.vmem %s16_s10, 256  ;;  %p141_p4 = scmp.lt.s32.totalorder %s16_s10, %s16_s10 }
   0xa   :  { %p137_p3 = scmp.ne.s32.totalorder %s16_s10, %s136_s18  ;;  %p142_p5 = scmp.lt.s32.totalorder %s136_s18, %s136_s18 }
   0xc   :  { %p143_p6 = por %p142_p5, %p141_p4 }
   0xe   :  { %p144_p7 = pnand %p143_p6, %p137_p3 }
  0x10   :  { %147 = shalt.err (!%p144_p7)
}
  0x11   :  { %s199_s19 = smov 128   ;;  %s200_s20 = smov 8  }
  0x12   :  { %21 = dma.hbm_to_vmem [thread:$0]  %s254_s0, 256, %s16_s10, [#allocation3], %s199_s19, %s199_s19, %s200_s20  }
  0x13   :  { %s201_s23 = smov [#allocation5]   ;;  %s148_s27 = scalar_lea.hbm %s255_s1, 256 }
  0x14   :  { %s27_s24 = sshll.u32 %s201_s23, 4  ;;  %p149_p8 = scmp.ne.s32.totalorder %s255_s1, %s148_s27  ;;  %s28_s24 = int_to_ptr.vmem [resolvable:$true] %s27_s24 }
  0x15   :  { %p152_p9 = scmp.lt.u32.totalorder %s148_s27, %s255_s1 }
  0x17   :  { %p154_p10 = pnand %p152_p9, %p149_p8 }
  0x19   :  { %157 = shalt.err (!%p154_p10)
}
  0x1a   :  { %s158_s4 = scalar_lea.vmem %s28_s24, 256  ;;  %p163_p12 = scmp.lt.s32.totalorder %s28_s24, %s28_s24 }
  0x1b   :  { %p159_p11 = scmp.ne.s32.totalorder %s28_s24, %s158_s4  ;;  %p164_p13 = scmp.lt.s32.totalorder %s158_s4, %s158_s4 }
  0x1d   :  { %p165_p0 = por %p164_p13, %p163_p12 }
  0x1f   :  { %p166_p1 = pnand %p165_p0, %p159_p11 }
  0x21   :  { %169 = shalt.err (!%p166_p1)
}
  0x22   :  { %33 = dma.hbm_to_vmem [thread:$0]  %s255_s1, 256, %s28_s24, [#allocation6], %s199_s19, %s199_s19, %s200_s20  }
  0x23   :  { %192 = dma.done.wait [#allocation3], 256  }
  0x24   :  { %193 = vsyncadd [#allocation3], 4294967040 }
  0x25   :  { %194 = dma.done.wait [#allocation6], 256  }
  0x26   :  { %195 = vsyncadd [#allocation6], 4294967040  ;;  %v40_v0 = vld [vmem:[#allocation2] sm:$0xff]  ;;  %v41_v1 = vld [vmem:[#allocation2 + $0x8] sm:$0xff]  ;;  %s202_s1 = smov [#allocation7]  }
  0x27   :  { %v44_v2 = vand.u32 2147483647, %v40_v0  ;;  %v45_v3 = vand.u32 2147483647, %v41_v1  ;;  %v42_v14 = vld [vmem:[#allocation5] sm:$0xff]  ;;  %v43_v15 = vld [vmem:[#allocation5 + $0x8] sm:$0xff] }
  0x28   :  { %v52_v17 = vmax.f32 %v40_v0, 0.0  ;;  %v54_v18 = vmul.f32 %v42_v14, %v40_v0  ;;  %v53_v21 = vmax.f32 %v41_v1, 0.0  ;;  %v55_v22 = vmul.f32 %v43_v15, %v41_v1  ;;  %s99_s6 = sshll.u32 %s202_s1, 4  ;;  %s100_s6 = int_to_ptr.vmem [resolvable:$true] %s99_s6 }
  0x29   :  { %v46_v4 = vsub.f32 0.0, %v44_v2  ;;  %v47_v5 = vsub.f32 0.0, %v45_v3  ;;  %s170_s7 = scalar_lea.vmem %s100_s6, 128  ;;  %p175_p3 = scmp.lt.s32.totalorder %s100_s6, %s100_s6 }
  0x2a   :  { %v56_v26 = vsub.f32 %v52_v17, %v54_v18  ;;  %v57_v29 = vsub.f32 %v53_v21, %v55_v22  ;;  %p171_p2 = scmp.ne.s32.totalorder %s100_s6, %s170_s7  ;;  %p176_p4 = scmp.lt.s32.totalorder %s170_s7, %s170_s7 }
  0x2b   :  { %v48_v6 = vmul.f32 1.442695, %v46_v4  ;;  %v50_v7 = vmul.f32 1.442695, %v47_v5 }
  0x2c   :  { %p177_p5 = por %p176_p4, %p175_p3 }
  0x2d   :  { %114 = vpow2.f32 %v48_v6 }
  0x2e   :  { %116 = vpow2.f32 %v50_v7  ;;  %p178_p6 = pnand %p177_p5, %p171_p2 }
  0x37   :  { %v115_v8 = vpop.eup %114 }
  0x38   :  { %v117_v9 = vpop.eup %116  ;;  %v58_v10 = vadd.f32 1.0, %v115_v8  ;;  %v61_v12 = vmul.f32 -0.5, %v115_v8  ;;  %v64_v19 = vand.u32 2147483647, %v115_v8 }
  0x39   :  { %v67_v11 = vadd.f32 1.0, %v117_v9  ;;  %v70_v13 = vmul.f32 -0.5, %v117_v9  ;;  %v73_v23 = vand.u32 2147483647, %v117_v9 }
  0x3a   :  { %118 = vlog2.f32 %v58_v10  ;;  %v62_v16 = vadd.f32 1.0, %v61_v12  ;;  %vm65_vm0 = vcmp.lt.f32.partialorder %v64_v19, 0.0004427343 }
  0x3b   :  { %120 = vlog2.f32 %v67_v11  ;;  %v71_v20 = vadd.f32 1.0, %v70_v13  ;;  %vm74_vm1 = vcmp.lt.f32.partialorder %v73_v23, 0.0004427343 }
  0x3c   :  { %v63_v24 = vmul.f32 %v115_v8, %v62_v16 }
  0x3d   :  { %v72_v27 = vmul.f32 %v117_v9, %v71_v20 }
  0x44   :  { %v119_v25 = vpop.eup %118 }
  0x45   :  { %v121_v28 = vpop.eup %120  ;;  %v60_v30 = vmul.f32 0.6931472, %v119_v25 }
  0x46   :  { %v69_v31 = vmul.f32 0.6931472, %v121_v28 }
  0x47   :  { %v66_v32 = vsel %vm65_vm0, %v63_v24, %v60_v30 }
  0x48   :  { %v75_v33 = vsel %vm74_vm1, %v72_v27, %v69_v31  ;;  %v76_v34 = vadd.f32 %v66_v32, %v56_v26 }
  0x49   :  { %v77_v35 = vadd.f32 %v75_v33, %v57_v29 }
  0x4a   :  { %v78_v36 = vsub.f32 0.0, %v76_v34 }
  0x4b   :  { %v79_v37 = vsub.f32 0.0, %v77_v35 }
  0x4c   :  { %v80_v38 = vmul.f32 1.442695, %v78_v36 }
  0x4d   :  { %v82_v39 = vmul.f32 1.442695, %v79_v37 }
  0x4e   :  { %122 = vpow2.f32 %v80_v38 }
  0x4f   :  { %124 = vpow2.f32 %v82_v39 }
  0x58   :  { %v123_v40 = vpop.eup %122 }
  0x59   :  { %v125_v41 = vpop.eup %124  ;;  %v84_v42 = vsub.f32 1.0, %v123_v40 }
  0x5a   :  { %v85_v43 = vsub.f32 1.0, %v125_v41 }
  0x5b   :  { %v86_v44 = vmul.f32 %v84_v42, %v84_v42 }
  0x5c   :  { %v87_v45 = vmul.f32 %v85_v43, %v85_v43 }
  0x5d   :  { %v88_v46 = vmul.f32 %v86_v44, %v76_v34 }
  0x5e   :  { %v89_v47 = vmul.f32 %v87_v45, %v77_v35 }
  0x60   :  { %v90_v48 = vadd.f32 %v89_v47, %v88_v46 }
  0x62   :  { %92 = vst [vmem:[#allocation7] sm:$0xff] %v90_v48 }
  0x63   :  { %181 = shalt.err (!%p178_p6)
}
  0x64   :  { %s182_s10 = scalar_lea.hbm %s256_s2, 128 }
  0x65   :  { %p183_p7 = scmp.ne.s32.totalorder %s256_s2, %s182_s10  ;;  %p186_p8 = scmp.lt.u32.totalorder %s182_s10, %s256_s2 }
  0x67   :  { %p188_p9 = pnand %p186_p8, %p183_p7 }
  0x69   :  { %191 = shalt.err (!%p188_p9)
}
  0x6a   :  { %102 = dma.vmem_to_hbm [thread:$0]  %s100_s6, 128, %s256_s2, [#allocation4]  }
  0x6b   :  { %196 = dma.done.wait [#allocation4], 128  }
  0x6c   :  { %197 = vsyncadd [#allocation4], 4294967168 }
  0x6d   :  { %106 = vsyncpa [#allocation3], 1 }
  0x6e   :  { %107 = vsyncpa [#allocation6], 1 }
  0x6f   :  { %108 = vsyncpa [#allocation4], 1 }

</bundles_post_ra>
